<compile_context>
chip_gen: v7x
topology: tpu7x:2x2x1
jax: 0.10.0
libtpu: 0.0.40
codegen_flags: <defaults>
</compile_context>

<pallas_src>
import jax
import jax.numpy as jnp
from jax.experimental import pallas as pl
from jax.experimental.pallas import tpu as pltpu


def lstm_kernel(xproj_ref, h0_ref, c0_ref, whh_ref, wl_ref, bl_ref, out_ref):
    """Serial LSTM recurrence over the full sequence, then the O=1 output head.

    xproj_ref: (S, B, 4H)  precomputed x_t @ W_ih^T + (b_ih + b_hh)
    h0_ref, c0_ref: (B, H)
    whh_ref: (H, 4H)   W_hh^T
    wl_ref:  (1, H)    linear weight row (output_size == 1)
    bl_ref:  (1, 1)    linear bias
    out_ref: (B, 1)
    """
    S = xproj_ref.shape[0]
    H = h0_ref.shape[1]

    def step(t, carry):
        h_prev, c_prev = carry
        # Only the recurrent matmul sits on the serial critical path.
        gates = xproj_ref[t] + jnp.dot(
            h_prev, whh_ref[...], preferred_element_type=jnp.float32)   # (B, 4H)

        # Two full-width transcendental passes (4H = 128 lanes = one vreg) instead of
        # four masked 32-lane ones; then slice the per-gate 32-lane chunks.
        sig = jax.nn.sigmoid(gates)
        tah = jnp.tanh(gates)
        i_g = sig[:, 0 * H:1 * H]
        f_g = sig[:, 1 * H:2 * H]
        g_g = tah[:, 2 * H:3 * H]
        o_g = sig[:, 3 * H:4 * H]

        c_new = f_g * c_prev + i_g * g_g
        h_new = o_g * jnp.tanh(c_new)
        return (h_new, c_new)

    h_fin, _ = jax.lax.fori_loop(
        0, S, step, (h0_ref[...], c0_ref[...]), unroll=True)

    # Final Linear with output_size == 1: VPU multiply + lane reduction (no 1-lane MXU matmul).
    out_ref[...] = (jnp.sum(h_fin * wl_ref[...], axis=-1, keepdims=True)
                    + bl_ref[...]).astype(out_ref.dtype)


def lstm_forward(x, h0, c0, w_ih, w_hh, b_ih, b_hh, w_lin, b_lin):
    """x: (batch, seq, input_size) [batch_first, matching the PyTorch module].
    Returns (batch, output_size)."""
    B, S, I = x.shape
    H = h0.shape[-1]
    O = w_lin.shape[0]
    assert O == 1, "kernel specializes the O=1 output head to a VPU reduction"

    # Hoist the embarrassingly-parallel input projection out of the serial chain:
    # one (S*B, I) @ (I, 4H) matmul for all time steps, bias folded in.
    x_tm = jnp.transpose(x, (1, 0, 2)).astype(jnp.float32)            # (S, B, I)
    wih_t = jnp.transpose(w_ih).astype(jnp.float32)                   # (I, 4H)
    b = (b_ih + b_hh).astype(jnp.float32)                             # (4H,)
    x_proj = (x_tm.reshape(S * B, I) @ wih_t + b).reshape(S, B, 4 * H)

    whh_t = jnp.transpose(w_hh).astype(jnp.float32)                   # (H, 4H)
    wl = w_lin.reshape(1, H).astype(jnp.float32)                      # (1, H)
    bl = b_lin.reshape(1, O).astype(jnp.float32)                      # (1, 1)

    return pl.pallas_call(
        lstm_kernel,
        out_shape=jax.ShapeDtypeStruct((B, O), jnp.float32),
        grid=(1,),  # single invocation; the time loop lives inside the kernel
        in_specs=[
            pl.BlockSpec((S, B, 4 * H), lambda i: (0, 0, 0)),   # x_proj
            pl.BlockSpec((B, H), lambda i: (0, 0)),             # h0
            pl.BlockSpec((B, H), lambda i: (0, 0)),             # c0
            pl.BlockSpec((H, 4 * H), lambda i: (0, 0)),         # W_hh^T
            pl.BlockSpec((1, H), lambda i: (0, 0)),             # linear weight row
            pl.BlockSpec((1, O), lambda i: (0, 0)),             # linear bias
        ],
        out_specs=pl.BlockSpec((B, O), lambda i: (0, 0)),
        compiler_params=pltpu.CompilerParams(
            dimension_semantics=("arbitrary",)),
    )(x_proj, h0.astype(jnp.float32), c0.astype(jnp.float32), whh_t, wl, bl)


def lstm_reference(x, h0, c0, w_ih, w_hh, b_ih, b_hh, w_lin, b_lin):
    """Pure-JAX reference (PyTorch nn.LSTM semantics, gate order i,f,g,o)."""
    H = h0.shape[-1]

    def step(carry, x_t):
        h, c = carry
        gates = x_t @ w_ih.T + h @ w_hh.T + b_ih + b_hh
        i = jax.nn.sigmoid(gates[:, 0 * H:1 * H])
        f = jax.nn.sigmoid(gates[:, 1 * H:2 * H])
        g = jnp.tanh(gates[:, 2 * H:3 * H])
        o = jax.nn.sigmoid(gates[:, 3 * H:4 * H])
        c_new = f * c + i * g
        h_new = o * jnp.tanh(c_new)
        return (h_new, c_new), None

    (h_fin, _), _ = jax.lax.scan(step, (h0, c0), jnp.transpose(x, (1, 0, 2)))
    return h_fin @ w_lin.T + b_lin


if __name__ == "__main__":
    # Module config: input_size=10, hidden_size=32, num_layers=1, output_size=1
    B, S, I, H, O = 2, 8, 10, 32, 1

    key = jax.random.PRNGKey(0)
    ks = jax.random.split(key, 9)

    # Deterministic parameter init (PyTorch-style uniform(-1/sqrt(H), 1/sqrt(H))).
    bound = 1.0 / jnp.sqrt(jnp.float32(H))
    w_ih = jax.random.uniform(ks[0], (4 * H, I), jnp.float32, -bound, bound)
    w_hh = jax.random.uniform(ks[1], (4 * H, H), jnp.float32, -bound, bound)
    b_ih = jax.random.uniform(ks[2], (4 * H,), jnp.float32, -bound, bound)
    b_hh = jax.random.uniform(ks[3], (4 * H,), jnp.float32, -bound, bound)
    w_lin = jax.random.uniform(ks[4], (O, H), jnp.float32, -bound, bound)
    b_lin = jax.random.uniform(ks[5], (O,), jnp.float32, -bound, bound)

    # Inputs. The torch forward draws h0/c0 from randn; we make them deterministic here.
    x = jax.random.normal(ks[6], (B, S, I), jnp.float32)
    h0 = jax.random.normal(ks[7], (B, H), jnp.float32)
    c0 = jax.random.normal(ks[8], (B, H), jnp.float32)

    out = lstm_forward(x, h0, c0, w_ih, w_hh, b_ih, b_hh, w_lin, b_lin)
    out = jax.block_until_ready(out)

    ref = lstm_reference(x, h0, c0, w_ih, w_hh, b_ih, b_hh, w_lin, b_lin)
    assert out.shape == (B, O)
    assert jnp.allclose(out, ref, atol=1e-4, rtol=1e-4), (out, ref)

    print("KERNEL_OK")
</pallas_src>

<mosaic_0001>
module attributes {stable_mosaic.version = 11 : i64} {
  func.func @lstm_kernel(%arg0: i32, %arg1: memref<8x2x128xf32, #tpu.memory_space<vmem>>, %arg2: memref<2x32xf32, #tpu.memory_space<vmem>>, %arg3: memref<2x32xf32, #tpu.memory_space<vmem>>, %arg4: memref<32x128xf32, #tpu.memory_space<vmem>>, %arg5: memref<1x32xf32, #tpu.memory_space<vmem>>, %arg6: memref<1x1xf32, #tpu.memory_space<vmem>>, %arg7: memref<2x1xf32, #tpu.memory_space<vmem>>) attributes {dimension_semantics = [#tpu.dimension_semantics<arbitrary>], iteration_bounds = array<i64: 1>, scalar_prefetch = 0 : i64, scratch_operands = 0 : i64, tpu.core_type = #tpu.core_type<tc>, window_params = [{pipeline_mode = #tpu.pipeline_mode<synchronous>, transform_indices = @transform_0, window_bounds = array<i64: 8, 2, 128>}, {pipeline_mode = #tpu.pipeline_mode<synchronous>, transform_indices = @transform_1, window_bounds = array<i64: 2, 32>}, {pipeline_mode = #tpu.pipeline_mode<synchronous>, transform_indices = @transform_2, window_bounds = array<i64: 2, 32>}, {pipeline_mode = #tpu.pipeline_mode<synchronous>, transform_indices = @transform_3, window_bounds = array<i64: 32, 128>}, {pipeline_mode = #tpu.pipeline_mode<synchronous>, transform_indices = @transform_4, window_bounds = array<i64: 1, 32>}, {pipeline_mode = #tpu.pipeline_mode<synchronous>, transform_indices = @transform_5, window_bounds = array<i64: 1, 1>}, {pipeline_mode = #tpu.pipeline_mode<synchronous>, transform_indices = @transform_6, window_bounds = array<i64: 2, 1>}]} {
    %c0 = arith.constant 0 : index
    %c0_0 = arith.constant 0 : index
    %0 = vector.load %arg2[%c0, %c0_0] : memref<2x32xf32, #tpu.memory_space<vmem>>, vector<2x32xf32>
    %c0_1 = arith.constant 0 : index
    %c0_2 = arith.constant 0 : index
    %1 = vector.load %arg3[%c0_1, %c0_2] : memref<2x32xf32, #tpu.memory_space<vmem>>, vector<2x32xf32>
    %c0_i32 = arith.constant 0 : i32
    %2 = arith.index_cast %c0_i32 : i32 to index
    %c0_3 = arith.constant 0 : index
    %c0_4 = arith.constant 0 : index
    %3 = vector.load %arg1[%2, %c0_3, %c0_4] : memref<8x2x128xf32, #tpu.memory_space<vmem>>, vector<1x2x128xf32>
    %4 = vector.shape_cast %3 : vector<1x2x128xf32> to vector<2x128xf32>
    %c0_5 = arith.constant 0 : index
    %c0_6 = arith.constant 0 : index
    %5 = vector.load %arg4[%c0_5, %c0_6] : memref<32x128xf32, #tpu.memory_space<vmem>>, vector<32x128xf32>
    %cst = arith.constant dense<0.000000e+00> : vector<2x128xf32>
    %6 = tpu.matmul %0, %5, %cst {dimension_numbers = #tpu.dot_dimension_numbers<[1], [0], [0], [1], [0, 0, 1, 1], [], []>} : vector<2x32xf32>, vector<32x128xf32>, vector<2x128xf32> -> vector<2x128xf32>
    %7 = arith.addf %4, %6 : vector<2x128xf32>
    %8 = arith.negf %7 : vector<2x128xf32>
    %9 = math.exp %8 : vector<2x128xf32>
    %cst_7 = arith.constant 1.000000e+00 : f32
    %10 = vector.broadcast %cst_7 : f32 to vector<2x128xf32>
    %11 = arith.addf %10, %9 : vector<2x128xf32>
    %12 = arith.divf %10, %11 : vector<2x128xf32>
    %13 = math.tanh %7 : vector<2x128xf32>
    %14 = vector.extract_strided_slice %12 {offsets = [0, 0], sizes = [2, 32], strides = [1, 1]} : vector<2x128xf32> to vector<2x32xf32>
    %15 = vector.extract_strided_slice %12 {offsets = [0, 32], sizes = [2, 32], strides = [1, 1]} : vector<2x128xf32> to vector<2x32xf32>
    %16 = vector.extract_strided_slice %13 {offsets = [0, 64], sizes = [2, 32], strides = [1, 1]} : vector<2x128xf32> to vector<2x32xf32>
    %17 = vector.extract_strided_slice %12 {offsets = [0, 96], sizes = [2, 32], strides = [1, 1]} : vector<2x128xf32> to vector<2x32xf32>
    %18 = arith.mulf %15, %1 : vector<2x32xf32>
    %19 = arith.mulf %14, %16 : vector<2x32xf32>
    %20 = arith.addf %18, %19 : vector<2x32xf32>
    %21 = math.tanh %20 : vector<2x32xf32>
    %22 = arith.mulf %17, %21 : vector<2x32xf32>
    %c1_i32 = arith.constant 1 : i32
    %23 = arith.index_cast %c1_i32 : i32 to index
    %c0_8 = arith.constant 0 : index
    %c0_9 = arith.constant 0 : index
    %24 = vector.load %arg1[%23, %c0_8, %c0_9] : memref<8x2x128xf32, #tpu.memory_space<vmem>>, vector<1x2x128xf32>
    %25 = vector.shape_cast %24 : vector<1x2x128xf32> to vector<2x128xf32>
    %c0_10 = arith.constant 0 : index
    %c0_11 = arith.constant 0 : index
    %26 = vector.load %arg4[%c0_10, %c0_11] : memref<32x128xf32, #tpu.memory_space<vmem>>, vector<32x128xf32>
    %cst_12 = arith.constant dense<0.000000e+00> : vector<2x128xf32>
    %27 = tpu.matmul %22, %26, %cst_12 {dimension_numbers = #tpu.dot_dimension_numbers<[1], [0], [0], [1], [0, 0, 1, 1], [], []>} : vector<2x32xf32>, vector<32x128xf32>, vector<2x128xf32> -> vector<2x128xf32>
    %28 = arith.addf %25, %27 : vector<2x128xf32>
    %29 = arith.negf %28 : vector<2x128xf32>
    %30 = math.exp %29 : vector<2x128xf32>
    %cst_13 = arith.constant 1.000000e+00 : f32
    %31 = vector.broadcast %cst_13 : f32 to vector<2x128xf32>
    %32 = arith.addf %31, %30 : vector<2x128xf32>
    %33 = arith.divf %31, %32 : vector<2x128xf32>
    %34 = math.tanh %28 : vector<2x128xf32>
    %35 = vector.extract_strided_slice %33 {offsets = [0, 0], sizes = [2, 32], strides = [1, 1]} : vector<2x128xf32> to vector<2x32xf32>
    %36 = vector.extract_strided_slice %33 {offsets = [0, 32], sizes = [2, 32], strides = [1, 1]} : vector<2x128xf32> to vector<2x32xf32>
    %37 = vector.extract_strided_slice %34 {offsets = [0, 64], sizes = [2, 32], strides = [1, 1]} : vector<2x128xf32> to vector<2x32xf32>
    %38 = vector.extract_strided_slice %33 {offsets = [0, 96], sizes = [2, 32], strides = [1, 1]} : vector<2x128xf32> to vector<2x32xf32>
    %39 = arith.mulf %36, %20 : vector<2x32xf32>
    %40 = arith.mulf %35, %37 : vector<2x32xf32>
    %41 = arith.addf %39, %40 : vector<2x32xf32>
    %42 = math.tanh %41 : vector<2x32xf32>
    %43 = arith.mulf %38, %42 : vector<2x32xf32>
    %c2_i32 = arith.constant 2 : i32
    %44 = arith.index_cast %c2_i32 : i32 to index
    %c0_14 = arith.constant 0 : index
    %c0_15 = arith.constant 0 : index
    %45 = vector.load %arg1[%44, %c0_14, %c0_15] : memref<8x2x128xf32, #tpu.memory_space<vmem>>, vector<1x2x128xf32>
    %46 = vector.shape_cast %45 : vector<1x2x128xf32> to vector<2x128xf32>
    %c0_16 = arith.constant 0 : index
    %c0_17 = arith.constant 0 : index
    %47 = vector.load %arg4[%c0_16, %c0_17] : memref<32x128xf32, #tpu.memory_space<vmem>>, vector<32x128xf32>
    %cst_18 = arith.constant dense<0.000000e+00> : vector<2x128xf32>
    %48 = tpu.matmul %43, %47, %cst_18 {dimension_numbers = #tpu.dot_dimension_numbers<[1], [0], [0], [1], [0, 0, 1, 1], [], []>} : vector<2x32xf32>, vector<32x128xf32>, vector<2x128xf32> -> vector<2x128xf32>
    %49 = arith.addf %46, %48 : vector<2x128xf32>
    %50 = arith.negf %49 : vector<2x128xf32>
    %51 = math.exp %50 : vector<2x128xf32>
    %cst_19 = arith.constant 1.000000e+00 : f32
    %52 = vector.broadcast %cst_19 : f32 to vector<2x128xf32>
    %53 = arith.addf %52, %51 : vector<2x128xf32>
    %54 = arith.divf %52, %53 : vector<2x128xf32>
    %55 = math.tanh %49 : vector<2x128xf32>
    %56 = vector.extract_strided_slice %54 {offsets = [0, 0], sizes = [2, 32], strides = [1, 1]} : vector<2x128xf32> to vector<2x32xf32>
    %57 = vector.extract_strided_slice %54 {offsets = [0, 32], sizes = [2, 32], strides = [1, 1]} : vector<2x128xf32> to vector<2x32xf32>
    %58 = vector.extract_strided_slice %55 {offsets = [0, 64], sizes = [2, 32], strides = [1, 1]} : vector<2x128xf32> to vector<2x32xf32>
    %59 = vector.extract_strided_slice %54 {offsets = [0, 96], sizes = [2, 32], strides = [1, 1]} : vector<2x128xf32> to vector<2x32xf32>
    %60 = arith.mulf %57, %41 : vector<2x32xf32>
    %61 = arith.mulf %56, %58 : vector<2x32xf32>
    %62 = arith.addf %60, %61 : vector<2x32xf32>
    %63 = math.tanh %62 : vector<2x32xf32>
    %64 = arith.mulf %59, %63 : vector<2x32xf32>
    %c3_i32 = arith.constant 3 : i32
    %65 = arith.index_cast %c3_i32 : i32 to index
    %c0_20 = arith.constant 0 : index
    %c0_21 = arith.constant 0 : index
    %66 = vector.load %arg1[%65, %c0_20, %c0_21] : memref<8x2x128xf32, #tpu.memory_space<vmem>>, vector<1x2x128xf32>
    %67 = vector.shape_cast %66 : vector<1x2x128xf32> to vector<2x128xf32>
    %c0_22 = arith.constant 0 : index
    %c0_23 = arith.constant 0 : index
    %68 = vector.load %arg4[%c0_22, %c0_23] : memref<32x128xf32, #tpu.memory_space<vmem>>, vector<32x128xf32>
    %cst_24 = arith.constant dense<0.000000e+00> : vector<2x128xf32>
    %69 = tpu.matmul %64, %68, %cst_24 {dimension_numbers = #tpu.dot_dimension_numbers<[1], [0], [0], [1], [0, 0, 1, 1], [], []>} : vector<2x32xf32>, vector<32x128xf32>, vector<2x128xf32> -> vector<2x128xf32>
    %70 = arith.addf %67, %69 : vector<2x128xf32>
    %71 = arith.negf %70 : vector<2x128xf32>
    %72 = math.exp %71 : vector<2x128xf32>
    %cst_25 = arith.constant 1.000000e+00 : f32
    %73 = vector.broadcast %cst_25 : f32 to vector<2x128xf32>
    %74 = arith.addf %73, %72 : vector<2x128xf32>
    %75 = arith.divf %73, %74 : vector<2x128xf32>
    %76 = math.tanh %70 : vector<2x128xf32>
    %77 = vector.extract_strided_slice %75 {offsets = [0, 0], sizes = [2, 32], strides = [1, 1]} : vector<2x128xf32> to vector<2x32xf32>
    %78 = vector.extract_strided_slice %75 {offsets = [0, 32], sizes = [2, 32], strides = [1, 1]} : vector<2x128xf32> to vector<2x32xf32>
    %79 = vector.extract_strided_slice %76 {offsets = [0, 64], sizes = [2, 32], strides = [1, 1]} : vector<2x128xf32> to vector<2x32xf32>
    %80 = vector.extract_strided_slice %75 {offsets = [0, 96], sizes = [2, 32], strides = [1, 1]} : vector<2x128xf32> to vector<2x32xf32>
    %81 = arith.mulf %78, %62 : vector<2x32xf32>
    %82 = arith.mulf %77, %79 : vector<2x32xf32>
    %83 = arith.addf %81, %82 : vector<2x32xf32>
    %84 = math.tanh %83 : vector<2x32xf32>
    %85 = arith.mulf %80, %84 : vector<2x32xf32>
    %c4_i32 = arith.constant 4 : i32
    %86 = arith.index_cast %c4_i32 : i32 to index
    %c0_26 = arith.constant 0 : index
    %c0_27 = arith.constant 0 : index
    %87 = vector.load %arg1[%86, %c0_26, %c0_27] : memref<8x2x128xf32, #tpu.memory_space<vmem>>, vector<1x2x128xf32>
    %88 = vector.shape_cast %87 : vector<1x2x128xf32> to vector<2x128xf32>
    %c0_28 = arith.constant 0 : index
    %c0_29 = arith.constant 0 : index
    %89 = vector.load %arg4[%c0_28, %c0_29] : memref<32x128xf32, #tpu.memory_space<vmem>>, vector<32x128xf32>
    %cst_30 = arith.constant dense<0.000000e+00> : vector<2x128xf32>
    %90 = tpu.matmul %85, %89, %cst_30 {dimension_numbers = #tpu.dot_dimension_numbers<[1], [0], [0], [1], [0, 0, 1, 1], [], []>} : vector<2x32xf32>, vector<32x128xf32>, vector<2x128xf32> -> vector<2x128xf32>
    %91 = arith.addf %88, %90 : vector<2x128xf32>
    %92 = arith.negf %91 : vector<2x128xf32>
    %93 = math.exp %92 : vector<2x128xf32>
    %cst_31 = arith.constant 1.000000e+00 : f32
    %94 = vector.broadcast %cst_31 : f32 to vector<2x128xf32>
    %95 = arith.addf %94, %93 : vector<2x128xf32>
    %96 = arith.divf %94, %95 : vector<2x128xf32>
    %97 = math.tanh %91 : vector<2x128xf32>
    %98 = vector.extract_strided_slice %96 {offsets = [0, 0], sizes = [2, 32], strides = [1, 1]} : vector<2x128xf32> to vector<2x32xf32>
    %99 = vector.extract_strided_slice %96 {offsets = [0, 32], sizes = [2, 32], strides = [1, 1]} : vector<2x128xf32> to vector<2x32xf32>
    %100 = vector.extract_strided_slice %97 {offsets = [0, 64], sizes = [2, 32], strides = [1, 1]} : vector<2x128xf32> to vector<2x32xf32>
    %101 = vector.extract_strided_slice %96 {offsets = [0, 96], sizes = [2, 32], strides = [1, 1]} : vector<2x128xf32> to vector<2x32xf32>
    %102 = arith.mulf %99, %83 : vector<2x32xf32>
    %103 = arith.mulf %98, %100 : vector<2x32xf32>
    %104 = arith.addf %102, %103 : vector<2x32xf32>
    %105 = math.tanh %104 : vector<2x32xf32>
    %106 = arith.mulf %101, %105 : vector<2x32xf32>
    %c5_i32 = arith.constant 5 : i32
    %107 = arith.index_cast %c5_i32 : i32 to index
    %c0_32 = arith.constant 0 : index
    %c0_33 = arith.constant 0 : index
    %108 = vector.load %arg1[%107, %c0_32, %c0_33] : memref<8x2x128xf32, #tpu.memory_space<vmem>>, vector<1x2x128xf32>
    %109 = vector.shape_cast %108 : vector<1x2x128xf32> to vector<2x128xf32>
    %c0_34 = arith.constant 0 : index
    %c0_35 = arith.constant 0 : index
    %110 = vector.load %arg4[%c0_34, %c0_35] : memref<32x128xf32, #tpu.memory_space<vmem>>, vector<32x128xf32>
    %cst_36 = arith.constant dense<0.000000e+00> : vector<2x128xf32>
    %111 = tpu.matmul %106, %110, %cst_36 {dimension_numbers = #tpu.dot_dimension_numbers<[1], [0], [0], [1], [0, 0, 1, 1], [], []>} : vector<2x32xf32>, vector<32x128xf32>, vector<2x128xf32> -> vector<2x128xf32>
    %112 = arith.addf %109, %111 : vector<2x128xf32>
    %113 = arith.negf %112 : vector<2x128xf32>
    %114 = math.exp %113 : vector<2x128xf32>
    %cst_37 = arith.constant 1.000000e+00 : f32
    %115 = vector.broadcast %cst_37 : f32 to vector<2x128xf32>
    %116 = arith.addf %115, %114 : vector<2x128xf32>
    %117 = arith.divf %115, %116 : vector<2x128xf32>
    %118 = math.tanh %112 : vector<2x128xf32>
    %119 = vector.extract_strided_slice %117 {offsets = [0, 0], sizes = [2, 32], strides = [1, 1]} : vector<2x128xf32> to vector<2x32xf32>
    %120 = vector.extract_strided_slice %117 {offsets = [0, 32], sizes = [2, 32], strides = [1, 1]} : vector<2x128xf32> to vector<2x32xf32>
    %121 = vector.extract_strided_slice %118 {offsets = [0, 64], sizes = [2, 32], strides = [1, 1]} : vector<2x128xf32> to vector<2x32xf32>
    %122 = vector.extract_strided_slice %117 {offsets = [0, 96], sizes = [2, 32], strides = [1, 1]} : vector<2x128xf32> to vector<2x32xf32>
    %123 = arith.mulf %120, %104 : vector<2x32xf32>
    %124 = arith.mulf %119, %121 : vector<2x32xf32>
    %125 = arith.addf %123, %124 : vector<2x32xf32>
    %126 = math.tanh %125 : vector<2x32xf32>
    %127 = arith.mulf %122, %126 : vector<2x32xf32>
    %c6_i32 = arith.constant 6 : i32
    %128 = arith.index_cast %c6_i32 : i32 to index
    %c0_38 = arith.constant 0 : index
    %c0_39 = arith.constant 0 : index
    %129 = vector.load %arg1[%128, %c0_38, %c0_39] : memref<8x2x128xf32, #tpu.memory_space<vmem>>, vector<1x2x128xf32>
    %130 = vector.shape_cast %129 : vector<1x2x128xf32> to vector<2x128xf32>
    %c0_40 = arith.constant 0 : index
    %c0_41 = arith.constant 0 : index
    %131 = vector.load %arg4[%c0_40, %c0_41] : memref<32x128xf32, #tpu.memory_space<vmem>>, vector<32x128xf32>
    %cst_42 = arith.constant dense<0.000000e+00> : vector<2x128xf32>
    %132 = tpu.matmul %127, %131, %cst_42 {dimension_numbers = #tpu.dot_dimension_numbers<[1], [0], [0], [1], [0, 0, 1, 1], [], []>} : vector<2x32xf32>, vector<32x128xf32>, vector<2x128xf32> -> vector<2x128xf32>
    %133 = arith.addf %130, %132 : vector<2x128xf32>
    %134 = arith.negf %133 : vector<2x128xf32>
    %135 = math.exp %134 : vector<2x128xf32>
    %cst_43 = arith.constant 1.000000e+00 : f32
    %136 = vector.broadcast %cst_43 : f32 to vector<2x128xf32>
    %137 = arith.addf %136, %135 : vector<2x128xf32>
    %138 = arith.divf %136, %137 : vector<2x128xf32>
    %139 = math.tanh %133 : vector<2x128xf32>
    %140 = vector.extract_strided_slice %138 {offsets = [0, 0], sizes = [2, 32], strides = [1, 1]} : vector<2x128xf32> to vector<2x32xf32>
    %141 = vector.extract_strided_slice %138 {offsets = [0, 32], sizes = [2, 32], strides = [1, 1]} : vector<2x128xf32> to vector<2x32xf32>
    %142 = vector.extract_strided_slice %139 {offsets = [0, 64], sizes = [2, 32], strides = [1, 1]} : vector<2x128xf32> to vector<2x32xf32>
    %143 = vector.extract_strided_slice %138 {offsets = [0, 96], sizes = [2, 32], strides = [1, 1]} : vector<2x128xf32> to vector<2x32xf32>
    %144 = arith.mulf %141, %125 : vector<2x32xf32>
    %145 = arith.mulf %140, %142 : vector<2x32xf32>
    %146 = arith.addf %144, %145 : vector<2x32xf32>
    %147 = math.tanh %146 : vector<2x32xf32>
    %148 = arith.mulf %143, %147 : vector<2x32xf32>
    %c7_i32 = arith.constant 7 : i32
    %149 = arith.index_cast %c7_i32 : i32 to index
    %c0_44 = arith.constant 0 : index
    %c0_45 = arith.constant 0 : index
    %150 = vector.load %arg1[%149, %c0_44, %c0_45] : memref<8x2x128xf32, #tpu.memory_space<vmem>>, vector<1x2x128xf32>
    %151 = vector.shape_cast %150 : vector<1x2x128xf32> to vector<2x128xf32>
    %c0_46 = arith.constant 0 : index
    %c0_47 = arith.constant 0 : index
    %152 = vector.load %arg4[%c0_46, %c0_47] : memref<32x128xf32, #tpu.memory_space<vmem>>, vector<32x128xf32>
    %cst_48 = arith.constant dense<0.000000e+00> : vector<2x128xf32>
    %153 = tpu.matmul %148, %152, %cst_48 {dimension_numbers = #tpu.dot_dimension_numbers<[1], [0], [0], [1], [0, 0, 1, 1], [], []>} : vector<2x32xf32>, vector<32x128xf32>, vector<2x128xf32> -> vector<2x128xf32>
    %154 = arith.addf %151, %153 : vector<2x128xf32>
    %155 = arith.negf %154 : vector<2x128xf32>
    %156 = math.exp %155 : vector<2x128xf32>
    %cst_49 = arith.constant 1.000000e+00 : f32
    %157 = vector.broadcast %cst_49 : f32 to vector<2x128xf32>
    %158 = arith.addf %157, %156 : vector<2x128xf32>
    %159 = arith.divf %157, %158 : vector<2x128xf32>
    %160 = math.tanh %154 : vector<2x128xf32>
    %161 = vector.extract_strided_slice %159 {offsets = [0, 0], sizes = [2, 32], strides = [1, 1]} : vector<2x128xf32> to vector<2x32xf32>
    %162 = vector.extract_strided_slice %159 {offsets = [0, 32], sizes = [2, 32], strides = [1, 1]} : vector<2x128xf32> to vector<2x32xf32>
    %163 = vector.extract_strided_slice %160 {offsets = [0, 64], sizes = [2, 32], strides = [1, 1]} : vector<2x128xf32> to vector<2x32xf32>
    %164 = vector.extract_strided_slice %159 {offsets = [0, 96], sizes = [2, 32], strides = [1, 1]} : vector<2x128xf32> to vector<2x32xf32>
    %165 = arith.mulf %162, %146 : vector<2x32xf32>
    %166 = arith.mulf %161, %163 : vector<2x32xf32>
    %167 = arith.addf %165, %166 : vector<2x32xf32>
    %168 = math.tanh %167 : vector<2x32xf32>
    %169 = arith.mulf %164, %168 : vector<2x32xf32>
    %c8_i32 = arith.constant 8 : i32
    %c0_50 = arith.constant 0 : index
    %c0_51 = arith.constant 0 : index
    %170 = vector.load %arg5[%c0_50, %c0_51] : memref<1x32xf32, #tpu.memory_space<vmem>>, vector<1x32xf32>
    %171 = vector.broadcast %170 : vector<1x32xf32> to vector<2x32xf32>
    %172 = arith.mulf %169, %171 : vector<2x32xf32>
    %cst_52 = arith.constant dense<0.000000e+00> : vector<2xf32>
    %173 = vector.multi_reduction <add>, %172, %cst_52 [1] : vector<2x32xf32> to vector<2xf32>
    %174 = vector.shape_cast %173 : vector<2xf32> to vector<2x1xf32>
    %c0_53 = arith.constant 0 : index
    %c0_54 = arith.constant 0 : index
    %175 = vector.load %arg6[%c0_53, %c0_54] : memref<1x1xf32, #tpu.memory_space<vmem>>, vector<1x1xf32>
    %176 = vector.broadcast %175 : vector<1x1xf32> to vector<2x1xf32>
    %177 = arith.addf %174, %176 : vector<2x1xf32>
    %c0_55 = arith.constant 0 : index
    %c0_56 = arith.constant 0 : index
    %178 = vector.load %arg7[%c0_55, %c0_56] : memref<2x1xf32, #tpu.memory_space<vmem>>, vector<2x1xf32>
    tpu.vector_store %arg7[%c0_55, %c0_56], %177 {strides = array<i32>} : memref<2x1xf32, #tpu.memory_space<vmem>>, vector<2x1xf32>,
    return
  }
  func.func @transform_0(%arg0: i32) -> (i32, i32, i32) {
    %c0_i32 = arith.constant 0 : i32
    %c0_i32_0 = arith.constant 0 : i32
    %c0_i32_1 = arith.constant 0 : i32
    %c0_i32_2 = arith.constant 0 : i32
    return %c0_i32, %c0_i32_0, %c0_i32_1 : i32, i32, i32
  }
  func.func @transform_1(%arg0: i32) -> (i32, i32) {
    %c0_i32 = arith.constant 0 : i32
    %c0_i32_0 = arith.constant 0 : i32
    %c0_i32_1 = arith.constant 0 : i32
    return %c0_i32, %c0_i32_0 : i32, i32
  }
  func.func @transform_2(%arg0: i32) -> (i32, i32) {
    %c0_i32 = arith.constant 0 : i32
    %c0_i32_0 = arith.constant 0 : i32
    %c0_i32_1 = arith.constant 0 : i32
    return %c0_i32, %c0_i32_0 : i32, i32
  }
  func.func @transform_3(%arg0: i32) -> (i32, i32) {
    %c0_i32 = arith.constant 0 : i32
    %c0_i32_0 = arith.constant 0 : i32
    %c0_i32_1 = arith.constant 0 : i32
    return %c0_i32, %c0_i32_0 : i32, i32
  }
  func.func @transform_4(%arg0: i32) -> (i32, i32) {
    %c0_i32 = arith.constant 0 : i32
    %c0_i32_0 = arith.constant 0 : i32
    %c0_i32_1 = arith.constant 0 : i32
    return %c0_i32, %c0_i32_0 : i32, i32
  }
  func.func @transform_5(%arg0: i32) -> (i32, i32) {
    %c0_i32 = arith.constant 0 : i32
    %c0_i32_0 = arith.constant 0 : i32
    %c0_i32_1 = arith.constant 0 : i32
    return %c0_i32, %c0_i32_0 : i32, i32
  }
  func.func @transform_6(%arg0: i32) -> (i32, i32) {
    %c0_i32 = arith.constant 0 : i32
    %c0_i32_0 = arith.constant 0 : i32
    %c0_i32_1 = arith.constant 0 : i32
    return %c0_i32, %c0_i32_0 : i32, i32
  }
}

</mosaic_0001>

<bundles_post_ra>
// kernel: tpu_custom_call.1
= control target key start
LH: loop header
LB: loop body
LE: loop exit
PB: predicated region body
PF: predicated region fallthrough
CT: control target
= control target key end

     0   :  { %s1408_s0 = inlined_call_operand.hbm [shape: f32[8,2,128], index: 0, kind: input, shape index: {}]   ;;  %s1409_s1 = inlined_call_operand.vmem [shape: f32[2,32], index: 1, kind: input, shape index: {}]   ;;  %s1410_s2 = inlined_call_operand.vmem [shape: f32[2,32], index: 2, kind: input, shape index: {}]   ;;  %s1411_s3 = inlined_call_operand.hbm [shape: f32[32,128], index: 3, kind: input, shape index: {}]   ;;  %s1412_s4 = inlined_call_operand.vmem [shape: f32[1,32], index: 4, kind: input, shape index: {}]   ;;  %s1413_s5 = inlined_call_operand.<no memory space> [shape: f32[1,1], index: 5, kind: input, shape index: {}]   ;;  %s1414_s6 = inlined_call_operand.vmem [shape: f32[2,1], index: 6, kind: output, shape index: {}]  }
   0x1   :  { %v11_v0 = vstv %s1413_s5 }
   0x2   :  { %12 = vst [vmem:[#allocation2] sm:$0x1] %v11_v0 }
   0x3   :  { %13 = vsyncpa [#allocation4], 0 }
   0x4   :  { %14 = vsyncpa [#allocation6], 0  ;;  %s1228_s23 = smov [#allocation3]   ;;  %s1180_s27 = scalar_lea.hbm %s1408_s0, 256 }
   0x5   :  { %s20_s24 = sshll.u32 %s1228_s23, 4  ;;  %p1181_p0 = scmp.ne.s32.totalorder %s1408_s0, %s1180_s27  ;;  %s21_s24 = int_to_ptr.vmem [resolvable:$true] %s20_s24 }
   0x6   :  { %p1184_p1 = scmp.lt.u32.totalorder %s1180_s27, %s1408_s0 }
   0x8   :  { %p1186_p2 = pnand %p1184_p1, %p1181_p0 }
   0xa   :  { %1189 = shalt.err (!%p1186_p2)
}
   0xb   :  { %s1190_s5 = scalar_lea.vmem %s21_s24, 256  ;;  %p1195_p4 = scmp.lt.s32.totalorder %s21_s24, %s21_s24 }
   0xc   :  { %p1191_p3 = scmp.ne.s32.totalorder %s21_s24, %s1190_s5  ;;  %p1196_p5 = scmp.lt.s32.totalorder %s1190_s5, %s1190_s5 }
   0xe   :  { %p1197_p6 = por %p1196_p5, %p1195_p4 }
  0x10   :  { %p1198_p7 = pnand %p1197_p6, %p1191_p3 }
  0x12   :  { %1201 = shalt.err (!%p1198_p7)
}
  0x13   :  { %s1229_s8 = smov 32   ;;  %s1230_s9 = smov 2  }
  0x14   :  { %26 = dma.hbm_to_vmem [thread:$0]  %s1408_s0, 256, %s21_s24, [#allocation4], %s1229_s8, %s1229_s8, %s1230_s9  }
  0x15   :  { %s1231_s12 = smov [#allocation5]   ;;  %s1202_s16 = scalar_lea.hbm %s1411_s3, 512 }
  0x16   :  { %s36_s13 = sshll.u32 %s1231_s12, 4  ;;  %p1203_p8 = scmp.ne.s32.totalorder %s1411_s3, %s1202_s16  ;;  %s37_s13 = int_to_ptr.vmem [resolvable:$true] %s36_s13 }
  0x17   :  { %p1206_p9 = scmp.lt.u32.totalorder %s1202_s16, %s1411_s3 }
  0x19   :  { %p1208_p10 = pnand %p1206_p9, %p1203_p8 }
  0x1b   :  { %1211 = shalt.err (!%p1208_p10)
}
  0x1c   :  { %s1212_s21 = scalar_lea.vmem %s37_s13, 512  ;;  %p1217_p12 = scmp.lt.s32.totalorder %s37_s13, %s37_s13 }
  0x1d   :  { %p1213_p11 = scmp.ne.s32.totalorder %s37_s13, %s1212_s21  ;;  %p1218_p13 = scmp.lt.s32.totalorder %s1212_s21, %s1212_s21 }
  0x1f   :  { %p1219_p0 = por %p1218_p13, %p1217_p12 }
  0x21   :  { %p1220_p1 = pnand %p1219_p0, %p1213_p11 }
  0x23   :  { %1223 = shalt.err (!%p1220_p1)
}
  0x24   :  { %s1232_s0 = smov 128   ;;  %s1233_s22 = smov 8  }
  0x25   :  { %42 = dma.hbm_to_vmem [thread:$0]  %s1411_s3, 512, %s37_s13, [#allocation6], %s1232_s0, %s1232_s0, %s1233_s22  }
  0x26   :  { %1224 = dma.done.wait [#allocation4], 256  }
  0x27   :  { %1225 = vsyncadd [#allocation4], 4294967040 }
  0x28   :  { %1226 = dma.done.wait [#allocation6], 512  }
  0x29   :  { %1227 = vsyncadd [#allocation6], 4294966784  ;;  %v1234_v1 = vmov 0.0|0.0   ;;  %vm1235_vm0 = vmmov 0   ;;  %v1236_v2 = vmov 0.0   ;;  %v56_v3 = vld [vmem:[#allocation5] sm:$0xff] }
  0x2a   :  { %1057 = vmatprep.subr.bf16.mxu0 %v1234_v1  ;;  %977 = vmatprep.mubr.msk.f32.mxu0 %vm1235_vm0, %v1236_v2  ;;  %v57_v4 = vld [vmem:[#allocation5 + $0x8] sm:$0xff]  ;;  %v58_v5 = vld [vmem:[#allocation5 + $0x10] sm:$0xff]  ;;  %v59_v7 = vld [vmem:[#allocation5 + $0x18] sm:$0xff]  ;;  %vm60_vm1 = vcmask 261120   ;;  %s1238_s29 = smov 96   ;;  %vm891_vm2 = vcmask 254976  }
  0x2b   :  { %1063 = vmatprep.subr.bf16.mxu1 %v1234_v1  ;;  %988 = vmatprep.mubr.msk.f32.mxu1 %vm1235_vm0, %v1236_v2  ;;  %v1309_v6 = vpack.c.bf16 %v57_v4, %v56_v3  ;;  %v1312_v8 = vpack.c.bf16 %v59_v7, %v58_v5  ;;  %v53_v9 = vld [vmem:[%s1409_s1] sm:$0x3]  ;;  %s1237_s1 = smov 64   ;;  %v164_v30 = vld [vmem:[#allocation3 + $0x2] sm:$0x3]  ;;  %vm903_vm3 = vcmask 1024  }
  0x2c   :  { %v55_v10 = vld [vmem:[#allocation3] sm:$0x3]  ;;  %v266_v48 = vld [vmem:[#allocation3 + $0x4] sm:$0x3]  ;;  %v368_v4 = vld [vmem:[#allocation3 + $0x6] sm:$0x3] }
  0x2d   :  { %1059 = vmatpush3.bf16.msra.mxu0 %v1309_v6  ;;  %1065 = vmatpush3.bf16.msra.mxu1 %v1309_v6  ;;  %v54_v15 = vld [vmem:[%s1410_s2] sm:$0x3] }
  0x2e   :  { %1060 = vmatprep.subr.bf16.mxu0 %v1234_v1  ;;  %1066 = vmatprep.subr.bf16.mxu1 %v1234_v1 }
  0x31   :  { %1062 = vmatpush3.bf16.msra.mxu0 %v1312_v8  ;;  %1068 = vmatpush3.bf16.msra.mxu1 %v1312_v8 }
  0x32   :  { %1069 = vmatprep.subr.bf16.mxu0 %v1234_v1  ;;  %1075 = vmatprep.subr.bf16.mxu1 %v1234_v1 }
  0x34   :  { %978 = vmatmul.mubr.msk.f32.vlgmr.msra.gmra.mrb[0].mxu0 %vm60_vm1, %v53_v9 }
  0x35   :  { %1071 = vmatpush3.bf16.msra.mxu0 %v1309_v6  ;;  %999 = vmatprep.mubr.msk.f32.mxu0 %vm1235_vm0, %v1236_v2 }
  0x36   :  { %1072 = vmatprep.subr.bf16.mxu0 %v1234_v1 }
  0x39   :  { %1074 = vmatpush3.bf16.msra.mxu0 %v1312_v8 }
  0x3a   :  { %1081 = vmatprep.subr.bf16.mxu0 %v1234_v1 }
 0x107   :  { %v130_v11 = vpop.f32.mrb[0].mxu0 }
 0x108   :  { %v134_v12 = vadd.f32 %v130_v11, %v55_v10  ;;  %v979_v13 = vpop.f32.mrb[1].mxu0 }
 0x10a   :  { %1116 = vtanh.f32 %v134_v12  ;;  %v912_v16 = vmul.f32 -1.442695, %v134_v12 }
 0x10c   :  { %1118 = vpow2.f32 %v912_v16 }
 0x114   :  { %v1117_v14 = vpop.eup %1116 }
 0x115   :  { %148 = vrot.lane.b32.xlu0 %v1117_v14, %s1237_s1 }
 0x116   :  { %v1119_v17 = vpop.eup %1118 }
 0x117   :  { %v138_v18 = vadd.f32 1.0, %v1119_v17 }
 0x119   :  { %143 = vrot.lane.b32.xlu0 %v54_v15, %s1229_s8  ;;  %1120 = vrcp.f32 %v138_v18 }
 0x123   :  { %v1121_v19 = vpop.eup %1120 }
 0x187   :  { %v149_v20 = vpop.permute.xlu0 %148 }
 0x188   :  { %v151_v21 = vmul.f32 %v1121_v19, %v149_v20 }
 0x18a   :  { %153 = vrot.lane.b32.xlu1 %v151_v21, %s1229_s8 }
 0x18b   :  { %v144_v22 = vpop.permute.xlu0 %143 }
 0x18c   :  { %v146_v23 = vmul.f32 %v1121_v19, %v144_v22 }
 0x1fc   :  { %v154_v24 = vpop.permute.xlu1 %153 }
 0x1fd   :  { %v156_v25 = vadd.f32 %v154_v24, %v146_v23  ;;  %v470_v24 = vld [vmem:[#allocation3 + $0x8] sm:$0x3] }
 0x1ff   :  { %1122 = vtanh.f32 %v156_v25 }
 0x209   :  { %v1123_v26 = vpop.eup %1122 }
 0x20a   :  { %159 = vrot.lane.b32.xlu1 %v1123_v26, %s1237_s1 }
 0x27c   :  { %v160_v27 = vpop.permute.xlu1 %159 }
 0x27d   :  { %v162_v28 = vmul.f32 %v1121_v19, %v160_v27 }
 0x27f   :  { %166 = vrot.lane.b32.xlu0 %v162_v28, %s1229_s8 }
 0x2f1   :  { %v167_v29 = vpop.permute.xlu0 %166 }
 0x2f2   :  { %989 = vmatmul.mubr.msk.f32.vlgmr.msra.gmra.mrb[0].mxu1 %vm60_vm1, %v167_v29 }
 0x2f3   :  { %1077 = vmatpush3.bf16.msra.mxu1 %v1309_v6  ;;  %1010 = vmatprep.mubr.msk.f32.mxu1 %vm1235_vm0, %v1236_v2 }
 0x2f4   :  { %1078 = vmatprep.subr.bf16.mxu1 %v1234_v1 }
 0x2f7   :  { %1080 = vmatpush3.bf16.msra.mxu1 %v1312_v8 }
 0x2f8   :  { %1087 = vmatprep.subr.bf16.mxu1 %v1234_v1 }
 0x3c5   :  { %v236_v31 = vpop.f32.mrb[0].mxu1 }
 0x3c6   :  { %v240_v32 = vadd.f32 %v236_v31, %v164_v30  ;;  %v990_v33 = vpop.f32.mrb[1].mxu1 }
 0x3c8   :  { %1124 = vtanh.f32 %v240_v32  ;;  %v914_v35 = vmul.f32 -1.442695, %v240_v32 }
 0x3ca   :  { %1126 = vpow2.f32 %v914_v35 }
 0x3d2   :  { %v1125_v34 = vpop.eup %1124 }
 0x3d3   :  { %250 = vrot.lane.b32.xlu1 %v1125_v34, %s1237_s1 }
 0x3d4   :  { %v1127_v36 = vpop.eup %1126 }
 0x3d5   :  { %v244_v37 = vadd.f32 1.0, %v1127_v36 }
 0x3d7   :  { %1128 = vrcp.f32 %v244_v37 }
 0x3e1   :  { %v1129_v38 = vpop.eup %1128 }
 0x3e2   :  { %v248_v41 = vmul.f32 %v1129_v38, %v156_v25 }
 0x445   :  { %v251_v39 = vpop.permute.xlu1 %250 }
 0x446   :  { %v253_v40 = vmul.f32 %v1129_v38, %v251_v39 }
 0x448   :  { %255 = vrot.lane.b32.xlu0 %v253_v40, %s1229_s8 }
 0x4ba   :  { %v256_v42 = vpop.permute.xlu0 %255 }
 0x4bb   :  { %v258_v43 = vadd.f32 %v256_v42, %v248_v41  ;;  %v572_v42 = vld [vmem:[#allocation3 + $0xa] sm:$0x3] }
 0x4bd   :  { %1130 = vtanh.f32 %v258_v43 }
 0x4c7   :  { %v1131_v44 = vpop.eup %1130 }
 0x4c8   :  { %261 = vrot.lane.b32.xlu1 %v1131_v44, %s1237_s1 }
 0x53a   :  { %v262_v45 = vpop.permute.xlu1 %261 }
 0x53b   :  { %v264_v46 = vmul.f32 %v1129_v38, %v262_v45 }
 0x53d   :  { %268 = vrot.lane.b32.xlu0 %v264_v46, %s1229_s8 }
 0x5af   :  { %v269_v47 = vpop.permute.xlu0 %268 }
 0x5b0   :  { %1000 = vmatmul.mubr.msk.f32.vlgmr.msra.gmra.mrb[2].mxu0 %vm60_vm1, %v269_v47 }
 0x5b1   :  { %1083 = vmatpush3.bf16.msra.mxu0 %v1309_v6  ;;  %1021 = vmatprep.mubr.msk.f32.mxu0 %vm1235_vm0, %v1236_v2 }
 0x5b2   :  { %1084 = vmatprep.subr.bf16.mxu0 %v1234_v1 }
 0x5b5   :  { %1086 = vmatpush3.bf16.msra.mxu0 %v1312_v8 }
 0x5b6   :  { %1093 = vmatprep.subr.bf16.mxu0 %v1234_v1 }
 0x683   :  { %v338_v49 = vpop.f32.mrb[2].mxu0 }
 0x684   :  { %v342_v50 = vadd.f32 %v338_v49, %v266_v48  ;;  %v1001_v51 = vpop.f32.mrb[3].mxu0 }
 0x686   :  { %1132 = vtanh.f32 %v342_v50  ;;  %v916_v53 = vmul.f32 -1.442695, %v342_v50 }
 0x688   :  { %1134 = vpow2.f32 %v916_v53 }
 0x690   :  { %v1133_v52 = vpop.eup %1132 }
 0x691   :  { %352 = vrot.lane.b32.xlu1 %v1133_v52, %s1237_s1 }
 0x692   :  { %v1135_v54 = vpop.eup %1134 }
 0x693   :  { %v346_v55 = vadd.f32 1.0, %v1135_v54 }
 0x695   :  { %1136 = vrcp.f32 %v346_v55 }
 0x69f   :  { %v1137_v56 = vpop.eup %1136 }
 0x6a0   :  { %v350_v59 = vmul.f32 %v1137_v56, %v258_v43 }
 0x703   :  { %v353_v57 = vpop.permute.xlu1 %352 }
 0x704   :  { %v355_v58 = vmul.f32 %v1137_v56, %v353_v57 }
 0x706   :  { %357 = vrot.lane.b32.xlu0 %v355_v58, %s1229_s8 }
 0x778   :  { %v358_v60 = vpop.permute.xlu0 %357 }
 0x779   :  { %v360_v61 = vadd.f32 %v358_v60, %v350_v59 }
 0x77b   :  { %1138 = vtanh.f32 %v360_v61 }
 0x785   :  { %v1139_v62 = vpop.eup %1138 }
 0x786   :  { %363 = vrot.lane.b32.xlu1 %v1139_v62, %s1237_s1 }
 0x7f8   :  { %v364_v63 = vpop.permute.xlu1 %363 }
 0x7f9   :  { %v366_v0 = vmul.f32 %v1137_v56, %v364_v63  ;;  %v674_v56 = vld [vmem:[#allocation3 + $0xc] sm:$0x3] }
 0x7fb   :  { %370 = vrot.lane.b32.xlu0 %v366_v0, %s1229_s8 }
 0x86d   :  { %v371_v3 = vpop.permute.xlu0 %370 }
 0x86e   :  { %1011 = vmatmul.mubr.msk.f32.vlgmr.msra.gmra.mrb[2].mxu1 %vm60_vm1, %v371_v3 }
 0x86f   :  { %1089 = vmatpush3.bf16.msra.mxu1 %v1309_v6  ;;  %1032 = vmatprep.mubr.msk.f32.mxu1 %vm1235_vm0, %v1236_v2 }
 0x870   :  { %1090 = vmatprep.subr.bf16.mxu1 %v1234_v1 }
 0x873   :  { %1092 = vmatpush3.bf16.msra.mxu1 %v1312_v8 }
 0x874   :  { %1099 = vmatprep.subr.bf16.mxu1 %v1234_v1 }
 0x941   :  { %v440_v5 = vpop.f32.mrb[2].mxu1 }
 0x942   :  { %v444_v7 = vadd.f32 %v440_v5, %v368_v4  ;;  %v1012_v9 = vpop.f32.mrb[3].mxu1 }
 0x944   :  { %1140 = vtanh.f32 %v444_v7  ;;  %v918_v11 = vmul.f32 -1.442695, %v444_v7 }
 0x946   :  { %1142 = vpow2.f32 %v918_v11 }
 0x94e   :  { %v1141_v10 = vpop.eup %1140 }
 0x94f   :  { %454 = vrot.lane.b32.xlu1 %v1141_v10, %s1237_s1 }
 0x950   :  { %v1143_v12 = vpop.eup %1142 }
 0x951   :  { %v448_v13 = vadd.f32 1.0, %v1143_v12 }
 0x953   :  { %1144 = vrcp.f32 %v448_v13 }
 0x95d   :  { %v1145_v14 = vpop.eup %1144 }
 0x95e   :  { %v452_v17 = vmul.f32 %v1145_v14, %v360_v61 }
 0x9c1   :  { %v455_v15 = vpop.permute.xlu1 %454 }
 0x9c2   :  { %v457_v16 = vmul.f32 %v1145_v14, %v455_v15 }
 0x9c4   :  { %459 = vrot.lane.b32.xlu0 %v457_v16, %s1229_s8 }
 0xa36   :  { %v460_v18 = vpop.permute.xlu0 %459 }
 0xa37   :  { %v462_v19 = vadd.f32 %v460_v18, %v452_v17 }
 0xa39   :  { %1146 = vtanh.f32 %v462_v19 }
 0xa43   :  { %v1147_v20 = vpop.eup %1146 }
 0xa44   :  { %465 = vrot.lane.b32.xlu1 %v1147_v20, %s1237_s1 }
 0xab6   :  { %v466_v21 = vpop.permute.xlu1 %465 }
 0xab7   :  { %v468_v22 = vmul.f32 %v1145_v14, %v466_v21  ;;  %v776_v14 = vld [vmem:[#allocation3 + $0xe] sm:$0x3] }
 0xab9   :  { %472 = vrot.lane.b32.xlu0 %v468_v22, %s1229_s8 }
 0xb2b   :  { %v473_v23 = vpop.permute.xlu0 %472 }
 0xb2c   :  { %1022 = vmatmul.mubr.msk.f32.vlgmr.msra.gmra.mrb[4].mxu0 %vm60_vm1, %v473_v23 }
 0xb2d   :  { %1095 = vmatpush3.bf16.msra.mxu0 %v1309_v6  ;;  %1043 = vmatprep.mubr.msk.f32.mxu0 %vm1235_vm0, %v1236_v2 }
 0xb2e   :  { %1096 = vmatprep.subr.bf16.mxu0 %v1234_v1 }
 0xb31   :  { %1098 = vmatpush3.bf16.msra.mxu0 %v1312_v8 }
 0xbff   :  { %v542_v25 = vpop.f32.mrb[4].mxu0 }
 0xc00   :  { %v546_v26 = vadd.f32 %v542_v25, %v470_v24  ;;  %v1023_v27 = vpop.f32.mrb[5].mxu0  ;;  %v927_v25 = vld [vmem:[%s1412_s4] ss:$0 sm:$0xff] }
 0xc02   :  { %1148 = vtanh.f32 %v546_v26  ;;  %v920_v29 = vmul.f32 -1.442695, %v546_v26 }
 0xc04   :  { %1150 = vpow2.f32 %v920_v29 }
 0xc0c   :  { %v1149_v28 = vpop.eup %1148 }
 0xc0d   :  { %556 = vrot.lane.b32.xlu1 %v1149_v28, %s1237_s1 }
 0xc0e   :  { %v1151_v30 = vpop.eup %1150 }
 0xc0f   :  { %v550_v31 = vadd.f32 1.0, %v1151_v30 }
 0xc11   :  { %1152 = vrcp.f32 %v550_v31 }
 0xc1b   :  { %v1153_v32 = vpop.eup %1152 }
 0xc1c   :  { %v554_v35 = vmul.f32 %v1153_v32, %v462_v19 }
 0xc7f   :  { %v557_v33 = vpop.permute.xlu1 %556 }
 0xc80   :  { %v559_v34 = vmul.f32 %v1153_v32, %v557_v33 }
 0xc82   :  { %561 = vrot.lane.b32.xlu0 %v559_v34, %s1229_s8 }
 0xcf4   :  { %v562_v36 = vpop.permute.xlu0 %561 }
 0xcf5   :  { %v564_v37 = vadd.f32 %v562_v36, %v554_v35  ;;  %v928_v36 = vld [vmem:[#allocation2] ss:$0 sm:$0xff] }
 0xcf7   :  { %1154 = vtanh.f32 %v564_v37 }
 0xd01   :  { %v1155_v38 = vpop.eup %1154 }
 0xd02   :  { %567 = vrot.lane.b32.xlu1 %v1155_v38, %s1237_s1 }
 0xd74   :  { %v568_v39 = vpop.permute.xlu1 %567 }
 0xd75   :  { %v570_v40 = vmul.f32 %v1153_v32, %v568_v39 }
 0xd77   :  { %574 = vrot.lane.b32.xlu0 %v570_v40, %s1229_s8 }
 0xde9   :  { %v575_v41 = vpop.permute.xlu0 %574 }
 0xdea   :  { %1033 = vmatmul.mubr.msk.f32.vlgmr.msra.gmra.mrb[4].mxu1 %vm60_vm1, %v575_v41 }
 0xdeb   :  { %1101 = vmatpush3.bf16.msra.mxu1 %v1309_v6  ;;  %1054 = vmatprep.mubr.msk.f32.mxu1 %vm1235_vm0, %v1236_v2 }
 0xdec   :  { %1102 = vmatprep.subr.bf16.mxu1 %v1234_v1 }
 0xdef   :  { %1104 = vmatpush3.bf16.msra.mxu1 %v1312_v8 }
 0xebd   :  { %v644_v43 = vpop.f32.mrb[4].mxu1 }
 0xebe   :  { %v648_v44 = vadd.f32 %v644_v43, %v572_v42  ;;  %v1034_v45 = vpop.f32.mrb[5].mxu1 }
 0xec0   :  { %1156 = vtanh.f32 %v648_v44  ;;  %v922_v47 = vmul.f32 -1.442695, %v648_v44 }
 0xec2   :  { %1158 = vpow2.f32 %v922_v47 }
 0xeca   :  { %v1157_v46 = vpop.eup %1156 }
 0xecb   :  { %658 = vrot.lane.b32.xlu1 %v1157_v46, %s1237_s1 }
 0xecc   :  { %v1159_v48 = vpop.eup %1158 }
 0xecd   :  { %v652_v49 = vadd.f32 1.0, %v1159_v48 }
 0xecf   :  { %1160 = vrcp.f32 %v652_v49 }
 0xed9   :  { %v1161_v6 = vpop.eup %1160 }
 0xeda   :  { %v656_v1 = vmul.f32 %v1161_v6, %v564_v37 }
 0xf3d   :  { %v659_v50 = vpop.permute.xlu1 %658 }
 0xf3e   :  { %v661_v2 = vmul.f32 %v1161_v6, %v659_v50 }
 0xf40   :  { %663 = vrot.lane.b32.xlu0 %v661_v2, %s1229_s8 }
 0xfb2   :  { %v664_v8 = vpop.permute.xlu0 %663 }
 0xfb3   :  { %v666_v51 = vadd.f32 %v664_v8, %v656_v1 }
 0xfb5   :  { %1162 = vtanh.f32 %v666_v51 }
 0xfbf   :  { %v1163_v52 = vpop.eup %1162 }
 0xfc0   :  { %669 = vrot.lane.b32.xlu1 %v1163_v52, %s1237_s1 }
0x1032   :  { %v670_v53 = vpop.permute.xlu1 %669 }
0x1033   :  { %v672_v54 = vmul.f32 %v1161_v6, %v670_v53 }
0x1035   :  { %676 = vrot.lane.b32.xlu0 %v672_v54, %s1229_s8 }
0x10a7   :  { %v677_v55 = vpop.permute.xlu0 %676 }
0x10a8   :  { %1044 = vmatmul.mubr.msk.f32.vlgmr.msra.gmra.mrb[6].mxu0 %vm60_vm1, %v677_v55 }
0x117b   :  { %v746_v57 = vpop.f32.mrb[6].mxu0 }
0x117c   :  { %v750_v58 = vadd.f32 %v746_v57, %v674_v56  ;;  %v1045_v59 = vpop.f32.mrb[7].mxu0 }
0x117e   :  { %1164 = vtanh.f32 %v750_v58  ;;  %v924_v61 = vmul.f32 -1.442695, %v750_v58 }
0x1180   :  { %1166 = vpow2.f32 %v924_v61 }
0x1188   :  { %v1165_v60 = vpop.eup %1164 }
0x1189   :  { %760 = vrot.lane.b32.xlu1 %v1165_v60, %s1237_s1 }
0x118a   :  { %v1167_v62 = vpop.eup %1166 }
0x118b   :  { %v754_v63 = vadd.f32 1.0, %v1167_v62 }
0x118d   :  { %1168 = vrcp.f32 %v754_v63 }
0x1197   :  { %v1169_v0 = vpop.eup %1168 }
0x1198   :  { %v758_v5 = vmul.f32 %v1169_v0, %v666_v51 }
0x11fb   :  { %v761_v3 = vpop.permute.xlu1 %760 }
0x11fc   :  { %v763_v4 = vmul.f32 %v1169_v0, %v761_v3 }
0x11fe   :  { %765 = vrot.lane.b32.xlu0 %v763_v4, %s1229_s8 }
0x1270   :  { %v766_v7 = vpop.permute.xlu0 %765 }
0x1271   :  { %v768_v9 = vadd.f32 %v766_v7, %v758_v5 }
0x1273   :  { %1170 = vtanh.f32 %v768_v9 }
0x127d   :  { %v1171_v10 = vpop.eup %1170 }
0x127e   :  { %771 = vrot.lane.b32.xlu1 %v1171_v10, %s1237_s1 }
0x12f0   :  { %v772_v11 = vpop.permute.xlu1 %771 }
0x12f1   :  { %v774_v12 = vmul.f32 %v1169_v0, %v772_v11 }
0x12f3   :  { %778 = vrot.lane.b32.xlu0 %v774_v12, %s1229_s8 }
0x1365   :  { %v779_v13 = vpop.permute.xlu0 %778 }
0x1366   :  { %1055 = vmatmul.mubr.msk.f32.vlgmr.msra.gmra.mrb[6].mxu1 %vm60_vm1, %v779_v13 }
0x1439   :  { %v848_v15 = vpop.f32.mrb[6].mxu1 }
0x143a   :  { %v852_v16 = vadd.f32 %v848_v15, %v776_v14  ;;  %v1056_v17 = vpop.f32.mrb[7].mxu1 }
0x143c   :  { %1172 = vtanh.f32 %v852_v16  ;;  %v926_v19 = vmul.f32 -1.442695, %v852_v16 }
0x143e   :  { %1174 = vpow2.f32 %v926_v19 }
0x1446   :  { %v1173_v18 = vpop.eup %1172 }
0x1447   :  { %862 = vrot.lane.b32.xlu1 %v1173_v18, %s1237_s1 }
0x1448   :  { %v1175_v20 = vpop.eup %1174 }
0x1449   :  { %v856_v21 = vadd.f32 1.0, %v1175_v20 }
0x144b   :  { %1176 = vrcp.f32 %v856_v21 }
0x1455   :  { %v1177_v22 = vpop.eup %1176 }
0x1456   :  { %v860_v26 = vmul.f32 %v1177_v22, %v768_v9 }
0x14b9   :  { %v863_v23 = vpop.permute.xlu1 %862 }
0x14ba   :  { %v865_v24 = vmul.f32 %v1177_v22, %v863_v23 }
0x14bc   :  { %867 = vrot.lane.b32.xlu0 %v865_v24, %s1229_s8 }
0x14c0   :  { %883 = vrot.lane.b32.xlu0 %v927_v25, %s1238_s29 }
0x152e   :  { %v868_v27 = vpop.permute.xlu0 %867 }
0x152f   :  { %v870_v28 = vadd.f32 %v868_v27, %v860_v26 }
0x1531   :  { %1178 = vtanh.f32 %v870_v28 }
0x1532   :  { %v884_v31 = vpop.permute.xlu0 %883 }
0x153b   :  { %v1179_v29 = vpop.eup %1178 }
0x153c   :  { %873 = vrot.lane.b32.xlu1 %v1179_v29, %s1237_s1 }
0x15ae   :  { %v874_v30 = vpop.permute.xlu1 %873 }
0x15af   :  { %v876_v32 = vmul.f32 %v1177_v22, %v874_v30 }
0x15b1   :  { %v886_v33 = vmul.f32 %v884_v31, %v876_v32 }
0x15b3   :  { %888 = vrot.lane.b32.xlu1 %v886_v33, %s1229_s8 }
0x1625   :  { %v889_v34 = vpop.permute.xlu1 %888 }
0x1626   :  { %v892_v35 = vsel %vm891_vm2, %v889_v34, 0.0 }
0x1627   :  { %893 = vadd.xlane.f32.xlu0 %v892_v35 }
0x16b4   :  { %v894_v37 = vpop.xlane.xlu0 %893 }
0x16b5   :  { %v902_v38 = vadd.f32 %v928_v36, %v894_v37 }
0x16b7   :  { %904 = vst.msk [vmem:[%s1414_s6] sm:$0x3] %vm903_vm3, %v902_v38 }
0x16b8   :  { %909 = vsyncpa [#allocation4], 1 }
0x16b9   :  { %910 = vsyncpa [#allocation6], 1 }

</bundles_post_ra>
